<compile_context>
chip_gen: v7x
topology: tpu7x:2x2x1
jax: 0.10.0
libtpu: 0.0.40
codegen_flags: <defaults>
</compile_context>

<pallas_src>
import jax
import jax.numpy as jnp
from jax.experimental import pallas as pl
from jax.experimental.pallas import tpu as pltpu


def _feedforward_kernel(x_ref, w1_ref, b1_ref, w2_ref, b2_ref, o_ref):
    # fc1: [TB, In] x [In, H] -> [TB, H]; f32 accumulation on the MXU.
    h = jnp.dot(x_ref[...], w1_ref[...], preferred_element_type=jnp.float32)
    h = jnp.maximum(h + b1_ref[...], 0.0)                    # bias + ReLU (f32)
    # fc2: [TB, H] x [H, Out_p] -> [TB, Out_p].
    out = jnp.dot(h.astype(w2_ref.dtype), w2_ref[...],
                  preferred_element_type=jnp.float32)
    o_ref[...] = (out + b2_ref[...]).astype(o_ref.dtype)     # bias in f32


def _round_up(n, m):
    return ((n + m - 1) // m) * m


def _cdiv(a, b):
    return (a + b - 1) // b


def _lane_multiple(out_features):
    """128-lane alignment on v5e and older (128x128 MXU); 256 on v6e/v7x
    (256x256 MXU) when Out is already >= 128."""
    if out_features < 128:
        return 128
    try:
        kind = jax.devices()[0].device_kind.lower()
    except Exception:
        return 128
    if any(t in kind for t in ("v2", "v3", "v4", "v5")):
        return 128
    return 256


def feedforward(x, w1, b1, w2, b2, *, tile_b=512, compute_dtype=jnp.bfloat16,
                vmem_budget_bytes=48 << 20):
    """Fused Linear -> ReLU -> Linear.

    x: [..., In]; w1: [H, In]; b1: [H]; w2: [Out, H]; b2: [Out]
    (PyTorch nn.Linear weight layout.)  Returns [..., Out] in x.dtype.
    """
    In = x.shape[-1]
    lead = x.shape[:-1]
    H, In_w = w1.shape
    Out, H_w = w2.shape
    assert In_w == In and H_w == H
    out_dtype = x.dtype

    x2 = x.reshape(-1, In)
    B = x2.shape[0]

    # ---- wrapper glue: layout plumbing ---------------------------------
    # TODO(synk): for repeated calls, fold the bf16 cast / transpose / Out
    # padding into parameter-init time instead of per forward call.
    Out_p = _round_up(Out, _lane_multiple(Out))        # lane-dense output
    if Out_p != Out:
        w2 = jnp.pad(w2, ((0, Out_p - Out), (0, 0)))
        b2 = jnp.pad(b2, ((0, Out_p - Out),))

    # Pre-transpose once so both matmuls are canonical [M,K]x[K,N] on the MXU.
    w1t = w1.T.astype(compute_dtype)                    # [In, H]
    w2t = w2.T.astype(compute_dtype)                    # [H, Out_p]
    b1_2d = b1.reshape(1, H).astype(jnp.float32)
    b2_2d = b2.reshape(1, Out_p).astype(jnp.float32)

    # ---- batch tiling: bf16 sublane (16-row) alignment, minimal padding,
    # tile shrunk to fit the v7x-safe VMEM budget.
    sub = 16 if jnp.dtype(compute_dtype).itemsize == 2 else 8
    B_min = _round_up(max(B, 1), sub)
    csize = jnp.dtype(compute_dtype).itemsize
    osize = jnp.dtype(out_dtype).itemsize

    def vmem_estimate(tb, w_bufs):
        weights = (In * H + H * Out_p) * csize * w_bufs   # resident weights
        biases = (H + Out_p) * 4 * w_bufs                 # resident f32 biases
        x_tiles = 2 * tb * In * csize                     # double-buffered in
        o_tiles = 2 * tb * Out_p * osize                  # double-buffered out
        h_tmp = tb * H * 4                                # f32 intermediate
        return weights + biases + x_tiles + o_tiles + h_tmp

    tb = _round_up(min(tile_b, B_min), sub)
    while tb > sub and vmem_estimate(tb, 2) > vmem_budget_bytes:
        tb = _round_up(tb // 2, sub)                      # v7x: 64 MiB / TC
    # Split the batch evenly over the implied grid so padding is bounded by
    # < one sublane group per tile (avoids the round-up-to-tile blow-up).
    grid_b = _cdiv(B_min, tb)
    tb = _round_up(_cdiv(B_min, grid_b), sub)
    B_pad = tb * grid_b

    xc = x2.astype(compute_dtype)
    if B_pad != B:
        xc = jnp.pad(xc, ((0, B_pad - B), (0, 0)))

    cost = pl.CostEstimate(
        flops=2 * B_pad * (In * H + H * Out_p),
        transcendentals=0,
        bytes_accessed=(B_pad * In * csize + H * In * csize + Out_p * H * csize
                        + 4 * (H + Out_p) + B_pad * Out_p * osize),
    )

    # TODO(synk): for layers whose weights cannot stay resident in v7x's
    # 64 MiB VMEM, add an Out_p grid axis (tile w2 as (tn, H)) and cache the
    # fc1 activation in a (tb, H) VMEM scratch under @pl.when(j == 0).
    def build(weight_bufs):
        w_kw = {"pipeline_mode": pl.Buffered(1)} if weight_bufs == 1 else {}
        vmem_limit = int(vmem_estimate(tb, weight_bufs) * 1.3) + (2 << 20)
        vmem_limit = max(32 << 20, min(vmem_limit, 128 << 20))
        return pl.pallas_call(
            _feedforward_kernel,
            out_shape=jax.ShapeDtypeStruct((B_pad, Out_p), out_dtype),
            grid_spec=pltpu.PrefetchScalarGridSpec(
                num_scalar_prefetch=0,
                grid=(grid_b,),
                in_specs=[
                    pl.BlockSpec((tb, In), lambda i: (i, 0)),            # x tile
                    pl.BlockSpec((In, H), lambda i: (0, 0), **w_kw),     # w1^T
                    pl.BlockSpec((1, H), lambda i: (0, 0), **w_kw),      # b1
                    pl.BlockSpec((H, Out_p), lambda i: (0, 0), **w_kw),  # w2^T
                    pl.BlockSpec((1, Out_p), lambda i: (0, 0), **w_kw),  # b2
                ],
                out_specs=pl.BlockSpec((tb, Out_p), lambda i: (i, 0)),
            ),
            compiler_params=pltpu.CompilerParams(
                dimension_semantics=("parallel",),   # batch is data-parallel
                vmem_limit_bytes=vmem_limit,
            ),
            cost_estimate=cost,
        )

    try:
        out = build(1)(xc, w1t, b1_2d, w2t, b2_2d)
    except Exception:
        # Fallback for environments where the auto-pipeline rejects
        # Buffered(1) on constant-index blocks: default double buffering.
        out = build(2)(xc, w1t, b1_2d, w2t, b2_2d)

    return out[:B, :Out].reshape(*lead, Out)


if __name__ == "__main__":
    # Small, forward-implied shapes: batch=8, input=32, hidden=64, output=16.
    B, IN, HID, OUT = 8, 32, 64, 16

    key = jax.random.PRNGKey(0)
    kx, k1, k2, k3, k4 = jax.random.split(key, 5)

    x = jax.random.normal(kx, (B, IN), dtype=jnp.float32)
    # Deterministic parameters (PyTorch Linear shapes: [out, in] / [out]).
    w1 = jax.random.normal(k1, (HID, IN), dtype=jnp.float32) * 0.1
    b1 = jax.random.normal(k2, (HID,), dtype=jnp.float32) * 0.1
    w2 = jax.random.normal(k3, (OUT, HID), dtype=jnp.float32) * 0.1
    b2 = jax.random.normal(k4, (OUT,), dtype=jnp.float32) * 0.1

    out = feedforward(x, w1, b1, w2, b2)
    out = jax.block_until_ready(out)

    # Pure-JAX f32 reference (bf16 matmul inputs => bf16-level tolerance).
    ref = jnp.maximum(x @ w1.T + b1, 0.0) @ w2.T + b2
    assert out.shape == (B, OUT)
    assert jnp.allclose(out, ref, atol=2e-2, rtol=2e-2), float(
        jnp.max(jnp.abs(out - ref)))

    print("KERNEL_OK")
</pallas_src>

<mosaic_0001>
module attributes {stable_mosaic.version = 11 : i64} {
  func.func @_feedforward_kernel(%arg0: i32, %arg1: memref<16x32xbf16, #tpu.memory_space<vmem>>, %arg2: memref<32x64xbf16, #tpu.memory_space<vmem>>, %arg3: memref<1x64xf32, #tpu.memory_space<vmem>>, %arg4: memref<64x128xbf16, #tpu.memory_space<vmem>>, %arg5: memref<1x128xf32, #tpu.memory_space<vmem>>, %arg6: memref<16x128xf32, #tpu.memory_space<vmem>>) attributes {dimension_semantics = [#tpu.dimension_semantics<parallel>], iteration_bounds = array<i64: 1>, scalar_prefetch = 0 : i64, scratch_operands = 0 : i64, tpu.core_type = #tpu.core_type<tc>, window_params = [{transform_indices = @transform_0, window_bounds = array<i64: 16, 32>}, {pipeline_mode = #tpu.pipeline_mode<synchronous>, transform_indices = @transform_1, window_bounds = array<i64: 32, 64>}, {pipeline_mode = #tpu.pipeline_mode<synchronous>, transform_indices = @transform_2, window_bounds = array<i64: 1, 64>}, {pipeline_mode = #tpu.pipeline_mode<synchronous>, transform_indices = @transform_3, window_bounds = array<i64: 64, 128>}, {pipeline_mode = #tpu.pipeline_mode<synchronous>, transform_indices = @transform_4, window_bounds = array<i64: 1, 128>}, {transform_indices = @transform_5, window_bounds = array<i64: 16, 128>}]} {
    %c0 = arith.constant 0 : index
    %c0_0 = arith.constant 0 : index
    %0 = vector.load %arg1[%c0, %c0_0] : memref<16x32xbf16, #tpu.memory_space<vmem>>, vector<16x32xbf16>
    %c0_1 = arith.constant 0 : index
    %c0_2 = arith.constant 0 : index
    %1 = vector.load %arg2[%c0_1, %c0_2] : memref<32x64xbf16, #tpu.memory_space<vmem>>, vector<32x64xbf16>
    %cst = arith.constant dense<0.000000e+00> : vector<16x64xf32>
    %2 = tpu.matmul %0, %1, %cst {dimension_numbers = #tpu.dot_dimension_numbers<[1], [0], [0], [1], [0, 0, 1, 1], [], []>} : vector<16x32xbf16>, vector<32x64xbf16>, vector<16x64xf32> -> vector<16x64xf32>
    %c0_3 = arith.constant 0 : index
    %c0_4 = arith.constant 0 : index
    %3 = vector.load %arg3[%c0_3, %c0_4] : memref<1x64xf32, #tpu.memory_space<vmem>>, vector<1x64xf32>
    %4 = vector.broadcast %3 : vector<1x64xf32> to vector<16x64xf32>
    %5 = arith.addf %2, %4 : vector<16x64xf32>
    %cst_5 = arith.constant 0.000000e+00 : f32
    %6 = vector.broadcast %cst_5 : f32 to vector<16x64xf32>
    %7 = arith.maximumf %5, %6 : vector<16x64xf32>
    %8 = arith.truncf %7 : vector<16x64xf32> to vector<16x64xbf16>
    %c0_6 = arith.constant 0 : index
    %c0_7 = arith.constant 0 : index
    %9 = vector.load %arg4[%c0_6, %c0_7] : memref<64x128xbf16, #tpu.memory_space<vmem>>, vector<64x128xbf16>
    %cst_8 = arith.constant dense<0.000000e+00> : vector<16x128xf32>
    %10 = tpu.matmul %8, %9, %cst_8 {dimension_numbers = #tpu.dot_dimension_numbers<[1], [0], [0], [1], [0, 0, 1, 1], [], []>} : vector<16x64xbf16>, vector<64x128xbf16>, vector<16x128xf32> -> vector<16x128xf32>
    %c0_9 = arith.constant 0 : index
    %c0_10 = arith.constant 0 : index
    %11 = vector.load %arg5[%c0_9, %c0_10] : memref<1x128xf32, #tpu.memory_space<vmem>>, vector<1x128xf32>
    %12 = vector.broadcast %11 : vector<1x128xf32> to vector<16x128xf32>
    %13 = arith.addf %10, %12 : vector<16x128xf32>
    %c0_11 = arith.constant 0 : index
    %c0_12 = arith.constant 0 : index
    %14 = vector.load %arg6[%c0_11, %c0_12] : memref<16x128xf32, #tpu.memory_space<vmem>>, vector<16x128xf32>
    tpu.vector_store %arg6[%c0_11, %c0_12], %13 {strides = array<i32>} : memref<16x128xf32, #tpu.memory_space<vmem>>, vector<16x128xf32>,
    return
  }
  func.func @transform_0(%arg0: i32) -> (i32, i32) {
    %c0_i32 = arith.constant 0 : i32
    %c0_i32_0 = arith.constant 0 : i32
    return %arg0, %c0_i32 : i32, i32
  }
  func.func @transform_1(%arg0: i32) -> (i32, i32) {
    %c0_i32 = arith.constant 0 : i32
    %c0_i32_0 = arith.constant 0 : i32
    %c0_i32_1 = arith.constant 0 : i32
    return %c0_i32, %c0_i32_0 : i32, i32
  }
  func.func @transform_2(%arg0: i32) -> (i32, i32) {
    %c0_i32 = arith.constant 0 : i32
    %c0_i32_0 = arith.constant 0 : i32
    %c0_i32_1 = arith.constant 0 : i32
    return %c0_i32, %c0_i32_0 : i32, i32
  }
  func.func @transform_3(%arg0: i32) -> (i32, i32) {
    %c0_i32 = arith.constant 0 : i32
    %c0_i32_0 = arith.constant 0 : i32
    %c0_i32_1 = arith.constant 0 : i32
    return %c0_i32, %c0_i32_0 : i32, i32
  }
  func.func @transform_4(%arg0: i32) -> (i32, i32) {
    %c0_i32 = arith.constant 0 : i32
    %c0_i32_0 = arith.constant 0 : i32
    %c0_i32_1 = arith.constant 0 : i32
    return %c0_i32, %c0_i32_0 : i32, i32
  }
  func.func @transform_5(%arg0: i32) -> (i32, i32) {
    %c0_i32 = arith.constant 0 : i32
    %c0_i32_0 = arith.constant 0 : i32
    return %arg0, %c0_i32 : i32, i32
  }
}

module attributes {stable_mosaic.version = 11 : i64} {
  func.func @_feedforward_kernel(%arg0: i32, %arg1: memref<16x32xbf16, #tpu.memory_space<vmem>>, %arg2: memref<32x64xbf16, #tpu.memory_space<vmem>>, %arg3: memref<1x64xf32, #tpu.memory_space<vmem>>, %arg4: memref<64x128xbf16, #tpu.memory_space<vmem>>, %arg5: memref<1x128xf32, #tpu.memory_space<vmem>>, %arg6: memref<16x128xf32, #tpu.memory_space<vmem>>) attributes {dimension_semantics = [#tpu.dimension_semantics<parallel>], iteration_bounds = array<i64: 1>, scalar_prefetch = 0 : i64, scratch_operands = 0 : i64, tpu.core_type = #tpu.core_type<tc>, window_params = [{transform_indices = @transform_0, window_bounds = array<i64: 16, 32>}, {pipeline_mode = #tpu.pipeline_mode<synchronous>, transform_indices = @transform_1, window_bounds = array<i64: 32, 64>}, {pipeline_mode = #tpu.pipeline_mode<synchronous>, transform_indices = @transform_2, window_bounds = array<i64: 1, 64>}, {pipeline_mode = #tpu.pipeline_mode<synchronous>, transform_indices = @transform_3, window_bounds = array<i64: 64, 128>}, {pipeline_mode = #tpu.pipeline_mode<synchronous>, transform_indices = @transform_4, window_bounds = array<i64: 1, 128>}, {transform_indices = @transform_5, window_bounds = array<i64: 16, 128>}]} {
    %c0 = arith.constant 0 : index
    %c0_0 = arith.constant 0 : index
    %0 = vector.load %arg1[%c0, %c0_0] : memref<16x32xbf16, #tpu.memory_space<vmem>>, vector<16x32xbf16>
    %c0_1 = arith.constant 0 : index
    %c0_2 = arith.constant 0 : index
    %1 = vector.load %arg2[%c0_1, %c0_2] : memref<32x64xbf16, #tpu.memory_space<vmem>>, vector<32x64xbf16>
    %cst = arith.constant dense<0.000000e+00> : vector<16x64xf32>
    %2 = tpu.matmul %0, %1, %cst {dimension_numbers = #tpu.dot_dimension_numbers<[1], [0], [0], [1], [0, 0, 1, 1], [], []>} : vector<16x32xbf16>, vector<32x64xbf16>, vector<16x64xf32> -> vector<16x64xf32>
    %c0_3 = arith.constant 0 : index
    %c0_4 = arith.constant 0 : index
    %3 = vector.load %arg3[%c0_3, %c0_4] : memref<1x64xf32, #tpu.memory_space<vmem>>, vector<1x64xf32>
    %4 = vector.broadcast %3 : vector<1x64xf32> to vector<16x64xf32>
    %5 = arith.addf %2, %4 : vector<16x64xf32>
    %cst_5 = arith.constant 0.000000e+00 : f32
    %6 = vector.broadcast %cst_5 : f32 to vector<16x64xf32>
    %7 = arith.maximumf %5, %6 : vector<16x64xf32>
    %8 = arith.truncf %7 : vector<16x64xf32> to vector<16x64xbf16>
    %c0_6 = arith.constant 0 : index
    %c0_7 = arith.constant 0 : index
    %9 = vector.load %arg4[%c0_6, %c0_7] : memref<64x128xbf16, #tpu.memory_space<vmem>>, vector<64x128xbf16>
    %cst_8 = arith.constant dense<0.000000e+00> : vector<16x128xf32>
    %10 = tpu.matmul %8, %9, %cst_8 {dimension_numbers = #tpu.dot_dimension_numbers<[1], [0], [0], [1], [0, 0, 1, 1], [], []>} : vector<16x64xbf16>, vector<64x128xbf16>, vector<16x128xf32> -> vector<16x128xf32>
    %c0_9 = arith.constant 0 : index
    %c0_10 = arith.constant 0 : index
    %11 = vector.load %arg5[%c0_9, %c0_10] : memref<1x128xf32, #tpu.memory_space<vmem>>, vector<1x128xf32>
    %12 = vector.broadcast %11 : vector<1x128xf32> to vector<16x128xf32>
    %13 = arith.addf %10, %12 : vector<16x128xf32>
    %c0_11 = arith.constant 0 : index
    %c0_12 = arith.constant 0 : index
    %14 = vector.load %arg6[%c0_11, %c0_12] : memref<16x128xf32, #tpu.memory_space<vmem>>, vector<16x128xf32>
    tpu.vector_store %arg6[%c0_11, %c0_12], %13 {strides = array<i32>} : memref<16x128xf32, #tpu.memory_space<vmem>>, vector<16x128xf32>,
    return
  }
  func.func @transform_0(%arg0: i32) -> (i32, i32) {
    %c0_i32 = arith.constant 0 : i32
    %c0_i32_0 = arith.constant 0 : i32
    return %arg0, %c0_i32 : i32, i32
  }
  func.func @transform_1(%arg0: i32) -> (i32, i32) {
    %c0_i32 = arith.constant 0 : i32
    %c0_i32_0 = arith.constant 0 : i32
    %c0_i32_1 = arith.constant 0 : i32
    return %c0_i32, %c0_i32_0 : i32, i32
  }
  func.func @transform_2(%arg0: i32) -> (i32, i32) {
    %c0_i32 = arith.constant 0 : i32
    %c0_i32_0 = arith.constant 0 : i32
    %c0_i32_1 = arith.constant 0 : i32
    return %c0_i32, %c0_i32_0 : i32, i32
  }
  func.func @transform_3(%arg0: i32) -> (i32, i32) {
    %c0_i32 = arith.constant 0 : i32
    %c0_i32_0 = arith.constant 0 : i32
    %c0_i32_1 = arith.constant 0 : i32
    return %c0_i32, %c0_i32_0 : i32, i32
  }
  func.func @transform_4(%arg0: i32) -> (i32, i32) {
    %c0_i32 = arith.constant 0 : i32
    %c0_i32_0 = arith.constant 0 : i32
    %c0_i32_1 = arith.constant 0 : i32
    return %c0_i32, %c0_i32_0 : i32, i32
  }
  func.func @transform_5(%arg0: i32) -> (i32, i32) {
    %c0_i32 = arith.constant 0 : i32
    %c0_i32_0 = arith.constant 0 : i32
    return %arg0, %c0_i32 : i32, i32
  }
}

</mosaic_0001>

<bundles_post_ra>
// kernel: tpu_custom_call.1
= control target key start
LH: loop header
LB: loop body
LE: loop exit
PB: predicated region body
PF: predicated region fallthrough
CT: control target
= control target key end

     0   :  { %10 = vsyncpa [#allocation3], 0  ;;  %s505_s0 = inlined_call_operand.hbm [shape: bf16[16,32], index: 0, kind: input, shape index: {}]   ;;  %s506_s1 = inlined_call_operand.hbm [shape: bf16[32,64], index: 1, kind: input, shape index: {}]   ;;  %s507_s2 = inlined_call_operand.vmem [shape: f32[1,64], index: 2, kind: input, shape index: {}]   ;;  %s508_s3 = inlined_call_operand.hbm [shape: bf16[64,128], index: 3, kind: input, shape index: {}]   ;;  %s509_s4 = inlined_call_operand.vmem [shape: f32[1,128], index: 4, kind: input, shape index: {}]   ;;  %s510_s5 = inlined_call_operand.hbm [shape: f32[16,128], index: 5, kind: output, shape index: {}]  }
   0x1   :  { %11 = vsyncpa [#allocation6], 0 }
   0x2   :  { %12 = vsyncpa [#allocation4], 0  ;;  %s395_s18 = smov [#allocation5]   ;;  %s396_s20 = smov [#allocation2]  }
   0x3   :  { %s30_s19 = sshll.u32 %s395_s18, 4  ;;  %s18_s21 = sshll.u32 %s396_s20, 4  ;;  %s31_s19 = int_to_ptr.vmem [resolvable:$true] %s30_s19  ;;  %s435_s21 = int_to_ptr.vmem [resolvable:$true] %s18_s21 }
   0x4   :  { %s301_s24 = scalar_lea.hbm %s506_s1, 256 }
   0x5   :  { %p302_p0 = scmp.ne.s32.totalorder %s506_s1, %s301_s24  ;;  %p305_p1 = scmp.lt.u32.totalorder %s301_s24, %s506_s1 }
   0x7   :  { %p307_p2 = pnand %p305_p1, %p302_p0 }
   0x9   :  { %310 = shalt.err (!%p307_p2)
}
   0xa   :  { %s311_s29 = scalar_lea.vmem %s31_s19, 256  ;;  %p316_p4 = scmp.lt.s32.totalorder %s31_s19, %s31_s19 }
   0xb   :  { %p312_p3 = scmp.ne.s32.totalorder %s31_s19, %s311_s29  ;;  %p317_p5 = scmp.lt.s32.totalorder %s311_s29, %s311_s29 }
   0xd   :  { %p318_p6 = por %p317_p5, %p316_p4 }
   0xf   :  { %p319_p7 = pnand %p318_p6, %p312_p3 }
  0x11   :  { %322 = shalt.err (!%p319_p7)
}
  0x12   :  { %s397_s30 = smov 64   ;;  %s398_s6 = smov 4  }
  0x13   :  { %36 = dma.hbm_to_vmem [thread:$0]  %s506_s1, 256, %s31_s19, [#allocation6], %s397_s30, %s397_s30, %s398_s6  }
  0x14   :  { %s323_s11 = scalar_lea.hbm %s505_s0, 128 }
  0x15   :  { %p324_p8 = scmp.ne.s32.totalorder %s505_s0, %s323_s11  ;;  %p327_p9 = scmp.lt.u32.totalorder %s323_s11, %s505_s0 }
  0x17   :  { %p329_p10 = pnand %p327_p9, %p324_p8 }
  0x19   :  { %332 = shalt.err (!%p329_p10)
}
  0x1a   :  { %s333_s16 = scalar_lea.vmem %s435_s21, 128  ;;  %p338_p12 = scmp.lt.s32.totalorder %s435_s21, %s435_s21 }
  0x1b   :  { %p334_p11 = scmp.ne.s32.totalorder %s435_s21, %s333_s16  ;;  %p339_p13 = scmp.lt.s32.totalorder %s333_s16, %s333_s16 }
  0x1d   :  { %p340_p0 = por %p339_p13, %p338_p12 }
  0x1f   :  { %p341_p1 = pnand %p340_p0, %p334_p11 }
  0x21   :  { %344 = shalt.err (!%p341_p1)
}
  0x22   :  { %24 = dma.hbm_to_vmem [thread:$0]  %s505_s0, 128, %s435_s21, [#allocation3], %s397_s30, %s397_s30, %s398_s6  }
  0x23   :  { %s399_s18 = smov [#allocation7]   ;;  %s345_s23 = scalar_lea.hbm %s508_s3, 512 }
  0x24   :  { %s44_s19 = sshll.u32 %s399_s18, 4  ;;  %p346_p2 = scmp.ne.s32.totalorder %s508_s3, %s345_s23  ;;  %s45_s19 = int_to_ptr.vmem [resolvable:$true] %s44_s19 }
  0x25   :  { %p349_p3 = scmp.lt.u32.totalorder %s345_s23, %s508_s3 }
  0x27   :  { %p351_p4 = pnand %p349_p3, %p346_p2 }
  0x29   :  { %354 = shalt.err (!%p351_p4)
}
  0x2a   :  { %s355_s28 = scalar_lea.vmem %s45_s19, 512  ;;  %p360_p6 = scmp.lt.s32.totalorder %s45_s19, %s45_s19 }
  0x2b   :  { %p356_p5 = scmp.ne.s32.totalorder %s45_s19, %s355_s28  ;;  %p361_p7 = scmp.lt.s32.totalorder %s355_s28, %s355_s28 }
  0x2d   :  { %p362_p8 = por %p361_p7, %p360_p6 }
  0x2f   :  { %p363_p9 = pnand %p362_p8, %p356_p5 }
  0x31   :  { %366 = shalt.err (!%p363_p9)
}
  0x32   :  { %50 = dma.hbm_to_vmem [thread:$0]  %s508_s3, 512, %s45_s19, [#allocation6], %s397_s30, %s397_s30, %s398_s6  }
  0x33   :  { %389 = dma.done.wait [#allocation3], 128  }
  0x34   :  { %390 = vsyncadd [#allocation3], 4294967168 }
  0x35   :  { %391 = dma.done.wait [#allocation6], 768  }
  0x36   :  { %392 = vsyncadd [#allocation6], 4294966528  ;;  %v400_v0 = vmov 0.0   ;;  %vm401_vm0 = vmmov 0   ;;  %v294_v1 = vld [vmem:[#allocation5] sm:$0xff]   ;;  %v295_v2 = vld [vmem:[#allocation5 + $0x8] sm:$0xff]  }
  0x37   :  { %264 = vmatprep.subr.bf16.mxu0 %v400_v0  ;;  %268 = vmatprep.mubr.msk.bf16.mxu0 %vm401_vm0, %v400_v0  ;;  %v297_v3 = vld [vmem:[#allocation7] sm:$0xff]   ;;  %v296_v4 = vld [vmem:[#allocation2] sm:$0xff]   ;;  %vm93_vm1 = vcmask 261120   ;;  %v299_v6 = vld [vmem:[#allocation7 + $0x10] sm:$0xff]   ;;  %vm180_vm2 = vcmask 523264   ;;  %s402_s7 = smov [#allocation8]  }
  0x38   :  { %272 = vmatprep.subr.bf16.mxu1 %v400_v0  ;;  %280 = vmatprep.mubr.msk.bf16.mxu1 %vm401_vm0, %v400_v0  ;;  %v298_v5 = vld [vmem:[#allocation7 + $0x8] sm:$0xff]   ;;  %v300_v7 = vld [vmem:[#allocation7 + $0x18] sm:$0xff]   ;;  %s232_s8 = sshll.u32 %s402_s7, 4  ;;  %s233_s8 = int_to_ptr.vmem [resolvable:$true] %s232_s8 }
  0x39   :  { %265 = vmatpush3.bf16.msra.mxu0 %v294_v1  ;;  %273 = vmatpush3.bf16.msra.mxu1 %v297_v3  ;;  %v245_v8 = vld [vmem:[%s507_s2] ss:$0 sm:$0xff]  ;;  %s367_s2 = scalar_lea.vmem %s233_s8, 256  ;;  %p372_p11 = scmp.lt.s32.totalorder %s233_s8, %s233_s8 }
  0x3a   :  { %266 = vmatprep.subr.bf16.mxu0 %v400_v0  ;;  %274 = vmatprep.subr.bf16.mxu1 %v400_v0  ;;  %v250_v18 = vld [vmem:[%s509_s4] ss:$0 sm:$0xff]  ;;  %p368_p10 = scmp.ne.s32.totalorder %s233_s8, %s367_s2  ;;  %p373_p12 = scmp.lt.s32.totalorder %s367_s2, %s367_s2 }
  0x3c   :  { %p374_p13 = por %p373_p12, %p372_p11 }
  0x3d   :  { %267 = vmatpush3.bf16.msra.mxu0 %v295_v2  ;;  %275 = vmatpush3.bf16.msra.mxu1 %v298_v5 }
  0x3e   :  { %276 = vmatprep.subr.bf16.mxu1 %v400_v0  ;;  %p375_p0 = pnand %p374_p13, %p368_p10 }
  0x40   :  { %269 = vmatmul.mubr.msk.bf16.vlgmr.msra.gmra.mrb[0].mxu0 %vm93_vm1, %v296_v4 }
  0x41   :  { %277 = vmatpush3.bf16.msra.mxu1 %v299_v6 }
  0x42   :  { %278 = vmatprep.subr.bf16.mxu1 %v400_v0 }
  0x45   :  { %279 = vmatpush3.bf16.msra.mxu1 %v300_v7 }
 0x113   :  { %v131_v9 = vpop.f32.mrb[0].mxu0 }
 0x114   :  { %v132_v10 = vadd.f32 %v245_v8, %v131_v9  ;;  %v270_v11 = vpop.f32.mrb[1].mxu0 }
 0x115   :  { %v134_v12 = vpop.f32.mrb[2].mxu0 }
 0x116   :  { %v135_v13 = vadd.f32 %v245_v8, %v134_v12  ;;  %v271_v14 = vpop.f32.mrb[3].mxu0  ;;  %v138_v15 = vmax.f32 %v132_v10, 0.0 }
 0x118   :  { %v139_v16 = vmax.f32 %v135_v13, 0.0 }
 0x11a   :  { %v140_v17 = vpack.c.bf16 %v139_v16, %v138_v15 }
 0x11c   :  { %281 = vmatmul.mubr.msk.bf16.vlgmr.msra.gmra.mrb[0].mxu1 %vm180_vm2, %v140_v17 }
 0x1ef   :  { %v218_v19 = vpop.f32.mrb[0].mxu1 }
 0x1f0   :  { %v219_v20 = vadd.f32 %v250_v18, %v218_v19  ;;  %v282_v21 = vpop.f32.mrb[1].mxu1 }
 0x1f1   :  { %v221_v22 = vpop.f32.mrb[2].mxu1 }
 0x1f2   :  { %225 = vst [vmem:[#allocation8] sm:$0xff] %v219_v20  ;;  %v222_v23 = vadd.f32 %v250_v18, %v221_v22  ;;  %v283_v24 = vpop.f32.mrb[3].mxu1 }
 0x1f4   :  { %226 = vst [vmem:[#allocation8 + $0x8] sm:$0xff] %v222_v23 }
 0x1f5   :  { %378 = shalt.err (!%p375_p0)
}
 0x1f6   :  { %s379_s10 = scalar_lea.hbm %s510_s5, 256 }
 0x1f7   :  { %p380_p1 = scmp.ne.s32.totalorder %s510_s5, %s379_s10  ;;  %p383_p2 = scmp.lt.u32.totalorder %s379_s10, %s510_s5 }
 0x1f9   :  { %p385_p3 = pnand %p383_p2, %p380_p1 }
 0x1fb   :  { %388 = shalt.err (!%p385_p3)
}
 0x1fc   :  { %s403_s15 = smov 128   ;;  %s404_s16 = smov 8  }
 0x1fd   :  { %238 = dma.vmem_to_hbm [thread:$0]  %s233_s8, 256, %s510_s5, [#allocation4], %s403_s15, %s403_s15, %s404_s16  }
 0x1fe   :  { %393 = dma.done.wait [#allocation4], 256  }
 0x1ff   :  { %394 = vsyncadd [#allocation4], 4294967040 }
 0x200   :  { %242 = vsyncpa [#allocation3], 1 }
 0x201   :  { %243 = vsyncpa [#allocation6], 1 }
 0x202   :  { %244 = vsyncpa [#allocation4], 1 }

// kernel: tpu_custom_call.1
= control target key start
LH: loop header
LB: loop body
LE: loop exit
PB: predicated region body
PF: predicated region fallthrough
CT: control target
= control target key end

     0   :  { %10 = vsyncpa [#allocation3], 0  ;;  %s505_s0 = inlined_call_operand.hbm [shape: bf16[16,32], index: 0, kind: input, shape index: {}]   ;;  %s506_s1 = inlined_call_operand.hbm [shape: bf16[32,64], index: 1, kind: input, shape index: {}]   ;;  %s507_s2 = inlined_call_operand.vmem [shape: f32[1,64], index: 2, kind: input, shape index: {}]   ;;  %s508_s3 = inlined_call_operand.hbm [shape: bf16[64,128], index: 3, kind: input, shape index: {}]   ;;  %s509_s4 = inlined_call_operand.vmem [shape: f32[1,128], index: 4, kind: input, shape index: {}]   ;;  %s510_s5 = inlined_call_operand.hbm [shape: f32[16,128], index: 5, kind: output, shape index: {}]  }
   0x1   :  { %11 = vsyncpa [#allocation6], 0 }
   0x2   :  { %12 = vsyncpa [#allocation4], 0  ;;  %s395_s18 = smov [#allocation5]   ;;  %s396_s20 = smov [#allocation2]  }
   0x3   :  { %s30_s19 = sshll.u32 %s395_s18, 4  ;;  %s18_s21 = sshll.u32 %s396_s20, 4  ;;  %s31_s19 = int_to_ptr.vmem [resolvable:$true] %s30_s19  ;;  %s435_s21 = int_to_ptr.vmem [resolvable:$true] %s18_s21 }
   0x4   :  { %s301_s24 = scalar_lea.hbm %s506_s1, 256 }
   0x5   :  { %p302_p0 = scmp.ne.s32.totalorder %s506_s1, %s301_s24  ;;  %p305_p1 = scmp.lt.u32.totalorder %s301_s24, %s506_s1 }
   0x7   :  { %p307_p2 = pnand %p305_p1, %p302_p0 }
   0x9   :  { %310 = shalt.err (!%p307_p2)
}
   0xa   :  { %s311_s29 = scalar_lea.vmem %s31_s19, 256  ;;  %p316_p4 = scmp.lt.s32.totalorder %s31_s19, %s31_s19 }
   0xb   :  { %p312_p3 = scmp.ne.s32.totalorder %s31_s19, %s311_s29  ;;  %p317_p5 = scmp.lt.s32.totalorder %s311_s29, %s311_s29 }
   0xd   :  { %p318_p6 = por %p317_p5, %p316_p4 }
   0xf   :  { %p319_p7 = pnand %p318_p6, %p312_p3 }
  0x11   :  { %322 = shalt.err (!%p319_p7)
}
  0x12   :  { %s397_s30 = smov 64   ;;  %s398_s6 = smov 4  }
  0x13   :  { %36 = dma.hbm_to_vmem [thread:$0]  %s506_s1, 256, %s31_s19, [#allocation6], %s397_s30, %s397_s30, %s398_s6  }
  0x14   :  { %s323_s11 = scalar_lea.hbm %s505_s0, 128 }
  0x15   :  { %p324_p8 = scmp.ne.s32.totalorder %s505_s0, %s323_s11  ;;  %p327_p9 = scmp.lt.u32.totalorder %s323_s11, %s505_s0 }
  0x17   :  { %p329_p10 = pnand %p327_p9, %p324_p8 }
  0x19   :  { %332 = shalt.err (!%p329_p10)
}
  0x1a   :  { %s333_s16 = scalar_lea.vmem %s435_s21, 128  ;;  %p338_p12 = scmp.lt.s32.totalorder %s435_s21, %s435_s21 }
  0x1b   :  { %p334_p11 = scmp.ne.s32.totalorder %s435_s21, %s333_s16  ;;  %p339_p13 = scmp.lt.s32.totalorder %s333_s16, %s333_s16 }
  0x1d   :  { %p340_p0 = por %p339_p13, %p338_p12 }
  0x1f   :  { %p341_p1 = pnand %p340_p0, %p334_p11 }
  0x21   :  { %344 = shalt.err (!%p341_p1)
}
  0x22   :  { %24 = dma.hbm_to_vmem [thread:$0]  %s505_s0, 128, %s435_s21, [#allocation3], %s397_s30, %s397_s30, %s398_s6  }
  0x23   :  { %s399_s18 = smov [#allocation7]   ;;  %s345_s23 = scalar_lea.hbm %s508_s3, 512 }
  0x24   :  { %s44_s19 = sshll.u32 %s399_s18, 4  ;;  %p346_p2 = scmp.ne.s32.totalorder %s508_s3, %s345_s23  ;;  %s45_s19 = int_to_ptr.vmem [resolvable:$true] %s44_s19 }
  0x25   :  { %p349_p3 = scmp.lt.u32.totalorder %s345_s23, %s508_s3 }
  0x27   :  { %p351_p4 = pnand %p349_p3, %p346_p2 }
  0x29   :  { %354 = shalt.err (!%p351_p4)
}
  0x2a   :  { %s355_s28 = scalar_lea.vmem %s45_s19, 512  ;;  %p360_p6 = scmp.lt.s32.totalorder %s45_s19, %s45_s19 }
  0x2b   :  { %p356_p5 = scmp.ne.s32.totalorder %s45_s19, %s355_s28  ;;  %p361_p7 = scmp.lt.s32.totalorder %s355_s28, %s355_s28 }
  0x2d   :  { %p362_p8 = por %p361_p7, %p360_p6 }
  0x2f   :  { %p363_p9 = pnand %p362_p8, %p356_p5 }
  0x31   :  { %366 = shalt.err (!%p363_p9)
}
  0x32   :  { %50 = dma.hbm_to_vmem [thread:$0]  %s508_s3, 512, %s45_s19, [#allocation6], %s397_s30, %s397_s30, %s398_s6  }
  0x33   :  { %389 = dma.done.wait [#allocation3], 128  }
  0x34   :  { %390 = vsyncadd [#allocation3], 4294967168 }
  0x35   :  { %391 = dma.done.wait [#allocation6], 768  }
  0x36   :  { %392 = vsyncadd [#allocation6], 4294966528  ;;  %v400_v0 = vmov 0.0   ;;  %vm401_vm0 = vmmov 0   ;;  %v294_v1 = vld [vmem:[#allocation5] sm:$0xff]   ;;  %v295_v2 = vld [vmem:[#allocation5 + $0x8] sm:$0xff]  }
  0x37   :  { %264 = vmatprep.subr.bf16.mxu0 %v400_v0  ;;  %268 = vmatprep.mubr.msk.bf16.mxu0 %vm401_vm0, %v400_v0  ;;  %v297_v3 = vld [vmem:[#allocation7] sm:$0xff]   ;;  %v296_v4 = vld [vmem:[#allocation2] sm:$0xff]   ;;  %vm93_vm1 = vcmask 261120   ;;  %v299_v6 = vld [vmem:[#allocation7 + $0x10] sm:$0xff]   ;;  %vm180_vm2 = vcmask 523264   ;;  %s402_s7 = smov [#allocation8]  }
  0x38   :  { %272 = vmatprep.subr.bf16.mxu1 %v400_v0  ;;  %280 = vmatprep.mubr.msk.bf16.mxu1 %vm401_vm0, %v400_v0  ;;  %v298_v5 = vld [vmem:[#allocation7 + $0x8] sm:$0xff]   ;;  %v300_v7 = vld [vmem:[#allocation7 + $0x18] sm:$0xff]   ;;  %s232_s8 = sshll.u32 %s402_s7, 4  ;;  %s233_s8 = int_to_ptr.vmem [resolvable:$true] %s232_s8 }
  0x39   :  { %265 = vmatpush3.bf16.msra.mxu0 %v294_v1  ;;  %273 = vmatpush3.bf16.msra.mxu1 %v297_v3  ;;  %v245_v8 = vld [vmem:[%s507_s2] ss:$0 sm:$0xff]  ;;  %s367_s2 = scalar_lea.vmem %s233_s8, 256  ;;  %p372_p11 = scmp.lt.s32.totalorder %s233_s8, %s233_s8 }
  0x3a   :  { %266 = vmatprep.subr.bf16.mxu0 %v400_v0  ;;  %274 = vmatprep.subr.bf16.mxu1 %v400_v0  ;;  %v250_v18 = vld [vmem:[%s509_s4] ss:$0 sm:$0xff]  ;;  %p368_p10 = scmp.ne.s32.totalorder %s233_s8, %s367_s2  ;;  %p373_p12 = scmp.lt.s32.totalorder %s367_s2, %s367_s2 }
  0x3c   :  { %p374_p13 = por %p373_p12, %p372_p11 }
  0x3d   :  { %267 = vmatpush3.bf16.msra.mxu0 %v295_v2  ;;  %275 = vmatpush3.bf16.msra.mxu1 %v298_v5 }
  0x3e   :  { %276 = vmatprep.subr.bf16.mxu1 %v400_v0  ;;  %p375_p0 = pnand %p374_p13, %p368_p10 }
  0x40   :  { %269 = vmatmul.mubr.msk.bf16.vlgmr.msra.gmra.mrb[0].mxu0 %vm93_vm1, %v296_v4 }
  0x41   :  { %277 = vmatpush3.bf16.msra.mxu1 %v299_v6 }
  0x42   :  { %278 = vmatprep.subr.bf16.mxu1 %v400_v0 }
  0x45   :  { %279 = vmatpush3.bf16.msra.mxu1 %v300_v7 }
 0x113   :  { %v131_v9 = vpop.f32.mrb[0].mxu0 }
 0x114   :  { %v132_v10 = vadd.f32 %v245_v8, %v131_v9  ;;  %v270_v11 = vpop.f32.mrb[1].mxu0 }
 0x115   :  { %v134_v12 = vpop.f32.mrb[2].mxu0 }
 0x116   :  { %v135_v13 = vadd.f32 %v245_v8, %v134_v12  ;;  %v271_v14 = vpop.f32.mrb[3].mxu0  ;;  %v138_v15 = vmax.f32 %v132_v10, 0.0 }
 0x118   :  { %v139_v16 = vmax.f32 %v135_v13, 0.0 }
 0x11a   :  { %v140_v17 = vpack.c.bf16 %v139_v16, %v138_v15 }
 0x11c   :  { %281 = vmatmul.mubr.msk.bf16.vlgmr.msra.gmra.mrb[0].mxu1 %vm180_vm2, %v140_v17 }
 0x1ef   :  { %v218_v19 = vpop.f32.mrb[0].mxu1 }
 0x1f0   :  { %v219_v20 = vadd.f32 %v250_v18, %v218_v19  ;;  %v282_v21 = vpop.f32.mrb[1].mxu1 }
 0x1f1   :  { %v221_v22 = vpop.f32.mrb[2].mxu1 }
 0x1f2   :  { %225 = vst [vmem:[#allocation8] sm:$0xff] %v219_v20  ;;  %v222_v23 = vadd.f32 %v250_v18, %v221_v22  ;;  %v283_v24 = vpop.f32.mrb[3].mxu1 }
 0x1f4   :  { %226 = vst [vmem:[#allocation8 + $0x8] sm:$0xff] %v222_v23 }
 0x1f5   :  { %378 = shalt.err (!%p375_p0)
}
 0x1f6   :  { %s379_s10 = scalar_lea.hbm %s510_s5, 256 }
 0x1f7   :  { %p380_p1 = scmp.ne.s32.totalorder %s510_s5, %s379_s10  ;;  %p383_p2 = scmp.lt.u32.totalorder %s379_s10, %s510_s5 }
 0x1f9   :  { %p385_p3 = pnand %p383_p2, %p380_p1 }
 0x1fb   :  { %388 = shalt.err (!%p385_p3)
}
 0x1fc   :  { %s403_s15 = smov 128   ;;  %s404_s16 = smov 8  }
 0x1fd   :  { %238 = dma.vmem_to_hbm [thread:$0]  %s233_s8, 256, %s510_s5, [#allocation4], %s403_s15, %s403_s15, %s404_s16  }
 0x1fe   :  { %393 = dma.done.wait [#allocation4], 256  }
 0x1ff   :  { %394 = vsyncadd [#allocation4], 4294967040 }
 0x200   :  { %242 = vsyncpa [#allocation3], 1 }
 0x201   :  { %243 = vsyncpa [#allocation6], 1 }
 0x202   :  { %244 = vsyncpa [#allocation4], 1 }

</bundles_post_ra>
